<compile_context>
chip_gen: v5e
topology: v5e:2x2
jax: 0.10.0
libtpu: 0.0.40
codegen_flags: <defaults>
</compile_context>

<pallas_src>
import functools

import jax
import jax.numpy as jnp
from jax.experimental import pallas as pl
from jax.experimental.pallas import tpu as pltpu


def _loss_sums_kernel(shift_ref, yp_ref, yt_ref, dp_ref, dt_ref, out_ref,
                      acc_ref, *, tm, nt, tiles_per_split, last_valid_rows,
                      has_phantom, has_row_tail):
    """Accumulate per-(sublane, lane) partial sums over row tiles.

    acc_ref (48, 128) f32, row-groups of 8:
      [ 0: 8] sum(y_true - y_shift)       [24:32] sum(d_true - d_shift)
      [ 8:16] sum((y_true - y_shift)^2)   [32:40] sum((d_true - d_shift)^2)
      [16:24] sum((y_pred - y_true)^2)    [40:48] sum((d_pred - d_true)^2)
    """
    c = pl.program_id(0)   # row split ("parallel": both TCs stream HBM on v7x)
    i = pl.program_id(1)   # row tile within split (reduction axis)
    tile = c * tiles_per_split + i   # logical (unclamped) tile id

    @pl.when(i == 0)
    def _():
        acc_ref[...] = jnp.zeros_like(acc_ref)

    yp = yp_ref[...].astype(jnp.float32)
    yt = yt_ref[...].astype(jnp.float32)
    dp = dp_ref[...].astype(jnp.float32)
    dt = dt_ref[...].astype(jnp.float32)

    # Center the "true" streams per variable (stabilizes the sum/sum^2 variance
    # formula for non-centered physical data; does not change the variance).
    ytc = yt - shift_ref[0:1, :]
    dtc = dt - shift_ref[1:2, :]
    dy = yp - yt
    dd = dp - dt

    if tm % 8 == 0:
        rows = 8

        def psum(x):               # (tm,128) -> (8,128): full-vreg VPU adds
            return jnp.sum(x.reshape(tm // 8, 8, 128), axis=0)
    else:                          # only when tm == M < 8 (tiny inputs)
        rows = tm

        def psum(x):
            return x

    def accumulate(a, b, e, f):
        acc_ref[0:rows, :] += psum(a)
        acc_ref[8:8 + rows, :] += psum(a * a)
        acc_ref[16:16 + rows, :] += psum(e * e)
        acc_ref[24:24 + rows, :] += psum(b)
        acc_ref[32:32 + rows, :] += psum(b * b)
        acc_ref[40:40 + rows, :] += psum(f * f)

    is_real = tile < nt
    is_last = tile == nt - 1

    if has_row_tail:
        # Only the single last logical tile pays for the row mask.
        @pl.when(is_last)
        def _():
            m = (jax.lax.broadcasted_iota(jnp.int32, (tm, 128), 0)
                 < last_valid_rows)
            z = jnp.float32(0.0)
            accumulate(jnp.where(m, ytc, z), jnp.where(m, dtc, z),
                       jnp.where(m, dy, z), jnp.where(m, dd, z))

        full = jnp.logical_not(is_last)
        if has_phantom:
            full = jnp.logical_and(full, is_real)

        @pl.when(full)
        def _():
            accumulate(ytc, dtc, dy, dd)
    elif has_phantom:
        @pl.when(is_real)   # skip wholly out-of-range clamped tiles entirely
        def _():
            accumulate(ytc, dtc, dy, dd)
    else:
        accumulate(ytc, dtc, dy, dd)

    @pl.when(i == pl.num_programs(1) - 1)
    def _():
        out_ref[...] = acc_ref[...]


def _compute_partial_sums(shifts, yp, yt, dp, dt, *, tm, nt, n_par,
                          tiles_per_split, last_valid_rows, has_phantom,
                          has_row_tail):
    """Run the lane-folded reduction; returns (n_par*48, 128) partial sums."""

    if has_phantom:
        def data_map(c, i):
            # Clamp so the DMA never targets a wholly out-of-range block (the
            # kernel skips accumulation for those using the logical tile id).
            return (jnp.minimum(c * tiles_per_split + i, nt - 1), 0)
    else:
        def data_map(c, i):
            return (c * tiles_per_split + i, 0)

    data_spec = pl.BlockSpec((tm, 128), data_map)
    shift_spec = pl.BlockSpec((8, 128), lambda c, i: (0, 0))  # resident, 1 DMA

    kernel = functools.partial(
        _loss_sums_kernel, tm=tm, nt=nt, tiles_per_split=tiles_per_split,
        last_valid_rows=last_valid_rows, has_phantom=has_phantom,
        has_row_tail=has_row_tail)

    elems = int(yt.size)
    in_bytes = sum(int(a.size) * jnp.dtype(a.dtype).itemsize
                   for a in (yp, yt, dp, dt))
    buf_bytes = sum(2 * tm * 128 * jnp.dtype(a.dtype).itemsize
                    for a in (yp, yt, dp, dt))
    vmem_limit = int(max(buf_bytes + (8 << 20), 32 << 20))

    return pl.pallas_call(
        kernel,
        out_shape=jax.ShapeDtypeStruct((n_par * 48, 128), jnp.float32),
        grid_spec=pltpu.PrefetchScalarGridSpec(
            num_scalar_prefetch=0,
            grid=(n_par, tiles_per_split),
            in_specs=[shift_spec, data_spec, data_spec, data_spec, data_spec],
            out_specs=pl.BlockSpec((48, 128), lambda c, i: (c, 0)),
            scratch_shapes=[pltpu.VMEM((48, 128), jnp.float32)],
        ),
        compiler_params=pltpu.CompilerParams(
            dimension_semantics=("parallel", "arbitrary"),
            vmem_limit_bytes=vmem_limit,
        ),
        cost_estimate=pl.CostEstimate(
            flops=18 * elems, transcendentals=0,
            bytes_accessed=in_bytes + int(shifts.size) * 4 + n_par * 48 * 128 * 4),
    )(shifts, yp, yt, dp, dt)


def adaptive_weighted_hybrid_loss(
    y_pred,
    y_true,
    derivatives_pred,
    derivatives_true,
    states_weight=None,
    *,
    lambda_data=1.0,
    lambda_physics=0.1,
    adaptive=True,
    row_tile=4096,
):
    """JAX/Pallas equivalent of AdaptiveWeightedHybridLoss.forward."""
    B, T, V = y_pred.shape
    N = B * T
    if V > 128:
        # TODO(synk): lane-folded path assumes num_vars <= 128; very wide state
        # vectors would need a (tm, V)-blocked variant instead.
        raise NotImplementedError("num_vars > 128 is not supported")
    if adaptive and states_weight is None:
        raise ValueError("states_weight must be provided when adaptive=True")

    # Smallest power of two >= V (hence a divisor of 128): lane l of the folded
    # layout then always holds variable (l % v_eff) regardless of the row.
    v_eff = 1
    while v_eff < V:
        v_eff *= 2

    row_tile = max(8, (int(row_tile) // 8) * 8)

    L = N * v_eff                      # valid elements after variable padding
    l_pad = ((L + 127) // 128) * 128   # tiny (<128 elem) pad only if needed
    M = l_pad // 128
    pad_samples = (l_pad - L) // v_eff  # zero "phantom" samples per variable

    if M >= 8:
        tm = min(row_tile, (M // 8) * 8)   # keep tm a multiple of 8
    else:
        tm = M
    nt = pl.cdiv(M, tm)
    # Split rows across the two TensorCores (v7x) only when it costs ~nothing:
    # either the split is exact, or it wastes at most one clamped tile of >= 8.
    if nt >= 2 and nt % 2 == 0:
        n_par = 2
    elif nt >= 8:
        n_par = 2
    else:
        n_par = 1
    tiles_per_split = pl.cdiv(nt, n_par)
    has_phantom = n_par * tiles_per_split != nt   # clamped OOB tiles exist
    has_row_tail = nt * tm != M                   # last block is partial
    last_valid_rows = M - (nt - 1) * tm

    def prep(x):
        # Common path (v_eff == V and L % 128 == 0): strictly reshape-only.
        if v_eff != V:
            # TODO(synk): V that does not divide 128 pays a full pad copy; a
            # (tm, v_pad)-lane-blocked kernel variant would avoid it.
            x = jnp.pad(x.reshape(N, V), ((0, 0), (0, v_eff - V)))
        flat = x.reshape(N * v_eff)    # free view of contiguous data
        if l_pad != N * v_eff:
            flat = jnp.pad(flat, (0, l_pad - N * v_eff))
        return flat.reshape(M, 128)

    yp = prep(y_pred)
    yt = prep(y_true)
    dp = prep(derivatives_pred)
    dt = prep(derivatives_true)

    y_shift = y_true[0, 0, :].astype(jnp.float32)
    d_shift = derivatives_true[0, 0, :].astype(jnp.float32)

    def lane_fold(vec):                # (V,) f32 -> (128,) lane-replicated
        if v_eff != V:
            vec = jnp.pad(vec, (0, v_eff - V))
        return jnp.tile(vec, 128 // v_eff)

    shifts = jnp.zeros((8, 128), jnp.float32)
    shifts = shifts.at[0].set(lane_fold(y_shift))
    shifts = shifts.at[1].set(lane_fold(d_shift))

    partials = _compute_partial_sums(
        shifts, yp, yt, dp, dt, tm=tm, nt=nt, n_par=n_par,
        tiles_per_split=tiles_per_split, last_valid_rows=last_valid_rows,
        has_phantom=has_phantom, has_row_tail=has_row_tail)

    acc = partials.reshape(n_par, 6, 8, 128).sum(axis=(0, 2))          # (6,128)
    per_var = acc.reshape(6, 128 // v_eff, v_eff).sum(axis=1)[:, :V]   # (6, V)

    if pad_samples > 0:
        # Remove the closed-form contribution of the zero-padded phantom
        # samples (only the centered y_true / d_true sums see them; the
        # pred-minus-true diffs of padded zeros are exactly zero).
        p = jnp.float32(pad_samples)
        per_var = per_var.at[0].add(p * y_shift)
        per_var = per_var.at[1].add(-p * y_shift * y_shift)
        per_var = per_var.at[3].add(p * d_shift)
        per_var = per_var.at[4].add(-p * d_shift * d_shift)

    n = jnp.float32(N)
    denom = jnp.maximum(n - 1.0, 1.0)   # guard B*T == 1 (torch would give NaN)

    # torch.std uses the unbiased estimator (correction=1) over dims (0, 1).
    mean_yc = per_var[0] / n
    var_y = jnp.maximum(per_var[1] - n * mean_yc**2, 0.0) / denom
    y_std = jnp.sqrt(var_y) + 1e-6
    mean_dc = per_var[3] / n
    var_d = jnp.maximum(per_var[4] - n * mean_dc**2, 0.0) / denom
    d_std = jnp.sqrt(var_d) + 1e-6

    if adaptive:
        weights = 3.0 * jax.nn.sigmoid(jnp.asarray(states_weight, jnp.float32))
    elif states_weight is not None:
        weights = jnp.asarray(states_weight, jnp.float32)
    else:
        weights = jnp.ones((V,), jnp.float32)

    # mean over (B,T,V) of (diff/std)^2 * w_v == sum_v SSE_v * w_v / std_v^2 / (B*T*V)
    data_loss = jnp.sum(per_var[2] / (y_std**2) * weights) / (n * V)
    physics_loss = jnp.sum(per_var[5] / (d_std**2) * weights) / (n * V)
    total_loss = lambda_data * data_loss + lambda_physics * physics_loss
    return total_loss, data_loss, physics_loss


def _reference(y_pred, y_true, d_pred, d_true, states_weight,
               lambda_data=1.0, lambda_physics=0.1):
    """Pure-JAX reference mirroring the PyTorch forward exactly."""
    y_std = jnp.std(y_true, axis=(0, 1), keepdims=True, ddof=1) + 1e-6
    d_std = jnp.std(d_true, axis=(0, 1), keepdims=True, ddof=1) + 1e-6
    data_losses = ((y_pred - y_true) / y_std) ** 2
    physics_losses = ((d_pred - d_true) / d_std) ** 2
    weights = (3.0 * jax.nn.sigmoid(states_weight)).reshape(1, 1, -1)
    data_loss = jnp.mean(data_losses * weights)
    physics_loss = jnp.mean(physics_losses * weights)
    total = lambda_data * data_loss + lambda_physics * physics_loss
    return total, data_loss, physics_loss


def _run_case(B, T, V, *, offset=0.0, row_tile=4096, dtype=jnp.float32,
              rtol=1e-5, atol=1e-5, seed=0):
    key = jax.random.PRNGKey(seed)
    k1, k2, k3, k4, k5 = jax.random.split(key, 5)
    y_pred = (offset + jax.random.normal(k1, (B, T, V), jnp.float32)).astype(dtype)
    y_true = (offset + jax.random.normal(k2, (B, T, V), jnp.float32)).astype(dtype)
    d_pred = jax.random.normal(k3, (B, T, V), jnp.float32).astype(dtype)
    d_true = jax.random.normal(k4, (B, T, V), jnp.float32).astype(dtype)
    states_weight = 0.1 * jax.random.normal(k5, (V,), jnp.float32)

    loss_fn = jax.jit(functools.partial(
        adaptive_weighted_hybrid_loss, lambda_data=1.0, lambda_physics=0.1,
        adaptive=True, row_tile=row_tile))
    total, data_loss, physics_loss = loss_fn(
        y_pred, y_true, d_pred, d_true, states_weight)
    jax.block_until_ready((total, data_loss, physics_loss))

    f32 = lambda a: a.astype(jnp.float32)
    ref_total, ref_data, ref_phys = _reference(
        f32(y_pred), f32(y_true), f32(d_pred), f32(d_true), states_weight)
    assert jnp.allclose(total, ref_total, rtol=rtol, atol=atol), (total, ref_total)
    assert jnp.allclose(data_loss, ref_data, rtol=rtol, atol=atol), (data_loss, ref_data)
    assert jnp.allclose(physics_loss, ref_phys, rtol=rtol, atol=atol), (physics_loss, ref_phys)


if __name__ == "__main__":
    # Primary small case consistent with forward(): [batch, time_steps, num_vars];
    # exercises the <128-element tail handled by the wrapper-side correction.
    _run_case(B=2, T=8, V=4, offset=0.0, rtol=1e-5, atol=1e-5, seed=0)
    # Non-power-of-two V and non-centered y_true (variable padding + shifted
    # variance path).
    _run_case(B=2, T=16, V=3, offset=5.0, rtol=1e-5, atol=1e-5, seed=1)
    # Multi-tile: odd tile count -> 2-way split with one clamped phantom tile,
    # plus a partial (masked) last tile.  (M=65 rows, tm=8, nt=9.)
    _run_case(B=4, T=520, V=4, row_tile=8, rtol=1e-4, atol=1e-4, seed=2)
    # Multi-tile exact 2-way split, no masking anywhere.  (M=32, tm=8, nt=4.)
    _run_case(B=4, T=256, V=4, row_tile=8, rtol=1e-4, atol=1e-4, seed=3)
    # bf16 inputs consumed directly by the kernel (f32 accumulation in-kernel).
    _run_case(B=2, T=64, V=4, dtype=jnp.bfloat16, rtol=1e-3, atol=1e-3, seed=4)

    print("KERNEL_OK")
</pallas_src>

<mosaic_0001>
module attributes {stable_mosaic.version = 11 : i64} {
  func.func @_loss_sums_kernel(%arg0: i32, %arg1: i32, %arg2: memref<8x128xf32, #tpu.memory_space<vmem>>, %arg3: memref<1x128xf32, #tpu.memory_space<vmem>>, %arg4: memref<1x128xf32, #tpu.memory_space<vmem>>, %arg5: memref<1x128xf32, #tpu.memory_space<vmem>>, %arg6: memref<1x128xf32, #tpu.memory_space<vmem>>, %arg7: memref<48x128xf32, #tpu.memory_space<vmem>>, %arg8: memref<48x128xf32, #tpu.memory_space<vmem>>) attributes {dimension_semantics = [#tpu.dimension_semantics<parallel>, #tpu.dimension_semantics<arbitrary>], iteration_bounds = array<i64: 1, 1>, scalar_prefetch = 0 : i64, scratch_operands = 1 : i64, tpu.core_type = #tpu.core_type<tc>, window_params = [{pipeline_mode = #tpu.pipeline_mode<synchronous>, transform_indices = @transform_0, window_bounds = array<i64: 8, 128>}, {transform_indices = @transform_1, window_bounds = array<i64: 1, 128>}, {transform_indices = @transform_2, window_bounds = array<i64: 1, 128>}, {transform_indices = @transform_3, window_bounds = array<i64: 1, 128>}, {transform_indices = @transform_4, window_bounds = array<i64: 1, 128>}, {transform_indices = @transform_5, window_bounds = array<i64: 48, 128>}]} {
    %c0_i32 = arith.constant 0 : i32
    %0 = arith.cmpi eq, %arg1, %c0_i32 : i32
    %1 = arith.extui %0 : i1 to i32
    %c0_i32_0 = arith.constant 0 : i32
    %2 = arith.cmpi ne, %1, %c0_i32_0 : i32
    scf.if %2 {
      %cst = arith.constant 0.000000e+00 : f32
      %38 = vector.broadcast %cst : f32 to vector<48x128xf32>
      %c0_32 = arith.constant 0 : index
      %c0_33 = arith.constant 0 : index
      %39 = vector.load %arg8[%c0_32, %c0_33] : memref<48x128xf32, #tpu.memory_space<vmem>>, vector<48x128xf32>
      tpu.vector_store %arg8[%c0_32, %c0_33], %38 {strides = array<i32>} : memref<48x128xf32, #tpu.memory_space<vmem>>, vector<48x128xf32>,
    } else {
    }
    %c0 = arith.constant 0 : index
    %c0_1 = arith.constant 0 : index
    %3 = vector.load %arg3[%c0, %c0_1] : memref<1x128xf32, #tpu.memory_space<vmem>>, vector<1x128xf32>
    %c0_2 = arith.constant 0 : index
    %c0_3 = arith.constant 0 : index
    %4 = vector.load %arg4[%c0_2, %c0_3] : memref<1x128xf32, #tpu.memory_space<vmem>>, vector<1x128xf32>
    %c0_4 = arith.constant 0 : index
    %c0_5 = arith.constant 0 : index
    %5 = vector.load %arg5[%c0_4, %c0_5] : memref<1x128xf32, #tpu.memory_space<vmem>>, vector<1x128xf32>
    %c0_6 = arith.constant 0 : index
    %c0_7 = arith.constant 0 : index
    %6 = vector.load %arg6[%c0_6, %c0_7] : memref<1x128xf32, #tpu.memory_space<vmem>>, vector<1x128xf32>
    %c0_8 = arith.constant 0 : index
    %c0_9 = arith.constant 0 : index
    %7 = vector.load %arg2[%c0_8, %c0_9] : memref<8x128xf32, #tpu.memory_space<vmem>>, vector<1x128xf32>
    %8 = arith.subf %4, %7 : vector<1x128xf32>
    %c1 = arith.constant 1 : index
    %c0_10 = arith.constant 0 : index
    %9 = vector.load %arg2[%c1, %c0_10] : memref<8x128xf32, #tpu.memory_space<vmem>>, vector<1x128xf32>
    %10 = arith.subf %6, %9 : vector<1x128xf32>
    %11 = arith.subf %3, %4 : vector<1x128xf32>
    %12 = arith.subf %5, %6 : vector<1x128xf32>
    %c0_11 = arith.constant 0 : index
    %c0_12 = arith.constant 0 : index
    %13 = vector.load %arg8[%c0_11, %c0_12] : memref<48x128xf32, #tpu.memory_space<vmem>>, vector<1x128xf32>
    %14 = arith.addf %13, %8 : vector<1x128xf32>
    %c0_13 = arith.constant 0 : index
    %c0_14 = arith.constant 0 : index
    %15 = vector.load %arg8[%c0_13, %c0_14] : memref<48x128xf32, #tpu.memory_space<vmem>>, vector<1x128xf32>
    tpu.vector_store %arg8[%c0_13, %c0_14], %14 {strides = array<i32>} : memref<48x128xf32, #tpu.memory_space<vmem>>, vector<1x128xf32>,
    %c8 = arith.constant 8 : index
    %c0_15 = arith.constant 0 : index
    %16 = vector.load %arg8[%c8, %c0_15] : memref<48x128xf32, #tpu.memory_space<vmem>>, vector<1x128xf32>
    %17 = arith.mulf %8, %8 : vector<1x128xf32>
    %18 = arith.addf %16, %17 : vector<1x128xf32>
    %c8_16 = arith.constant 8 : index
    %c0_17 = arith.constant 0 : index
    %19 = vector.load %arg8[%c8_16, %c0_17] : memref<48x128xf32, #tpu.memory_space<vmem>>, vector<1x128xf32>
    tpu.vector_store %arg8[%c8_16, %c0_17], %18 {strides = array<i32>} : memref<48x128xf32, #tpu.memory_space<vmem>>, vector<1x128xf32>,
    %c16 = arith.constant 16 : index
    %c0_18 = arith.constant 0 : index
    %20 = vector.load %arg8[%c16, %c0_18] : memref<48x128xf32, #tpu.memory_space<vmem>>, vector<1x128xf32>
    %21 = arith.mulf %11, %11 : vector<1x128xf32>
    %22 = arith.addf %20, %21 : vector<1x128xf32>
    %c16_19 = arith.constant 16 : index
    %c0_20 = arith.constant 0 : index
    %23 = vector.load %arg8[%c16_19, %c0_20] : memref<48x128xf32, #tpu.memory_space<vmem>>, vector<1x128xf32>
    tpu.vector_store %arg8[%c16_19, %c0_20], %22 {strides = array<i32>} : memref<48x128xf32, #tpu.memory_space<vmem>>, vector<1x128xf32>,
    %c24 = arith.constant 24 : index
    %c0_21 = arith.constant 0 : index
    %24 = vector.load %arg8[%c24, %c0_21] : memref<48x128xf32, #tpu.memory_space<vmem>>, vector<1x128xf32>
    %25 = arith.addf %24, %10 : vector<1x128xf32>
    %c24_22 = arith.constant 24 : index
    %c0_23 = arith.constant 0 : index
    %26 = vector.load %arg8[%c24_22, %c0_23] : memref<48x128xf32, #tpu.memory_space<vmem>>, vector<1x128xf32>
    tpu.vector_store %arg8[%c24_22, %c0_23], %25 {strides = array<i32>} : memref<48x128xf32, #tpu.memory_space<vmem>>, vector<1x128xf32>,
    %c32 = arith.constant 32 : index
    %c0_24 = arith.constant 0 : index
    %27 = vector.load %arg8[%c32, %c0_24] : memref<48x128xf32, #tpu.memory_space<vmem>>, vector<1x128xf32>
    %28 = arith.mulf %10, %10 : vector<1x128xf32>
    %29 = arith.addf %27, %28 : vector<1x128xf32>
    %c32_25 = arith.constant 32 : index
    %c0_26 = arith.constant 0 : index
    %30 = vector.load %arg8[%c32_25, %c0_26] : memref<48x128xf32, #tpu.memory_space<vmem>>, vector<1x128xf32>
    tpu.vector_store %arg8[%c32_25, %c0_26], %29 {strides = array<i32>} : memref<48x128xf32, #tpu.memory_space<vmem>>, vector<1x128xf32>,
    %c40 = arith.constant 40 : index
    %c0_27 = arith.constant 0 : index
    %31 = vector.load %arg8[%c40, %c0_27] : memref<48x128xf32, #tpu.memory_space<vmem>>, vector<1x128xf32>
    %32 = arith.mulf %12, %12 : vector<1x128xf32>
    %33 = arith.addf %31, %32 : vector<1x128xf32>
    %c40_28 = arith.constant 40 : index
    %c0_29 = arith.constant 0 : index
    %34 = vector.load %arg8[%c40_28, %c0_29] : memref<48x128xf32, #tpu.memory_space<vmem>>, vector<1x128xf32>
    tpu.vector_store %arg8[%c40_28, %c0_29], %33 {strides = array<i32>} : memref<48x128xf32, #tpu.memory_space<vmem>>, vector<1x128xf32>,
    %c0_i32_30 = arith.constant 0 : i32
    %35 = arith.cmpi eq, %arg1, %c0_i32_30 : i32
    %36 = arith.extui %35 : i1 to i32
    %c0_i32_31 = arith.constant 0 : i32
    %37 = arith.cmpi ne, %36, %c0_i32_31 : i32
    scf.if %37 {
      %c0_32 = arith.constant 0 : index
      %c0_33 = arith.constant 0 : index
      %38 = vector.load %arg8[%c0_32, %c0_33] : memref<48x128xf32, #tpu.memory_space<vmem>>, vector<48x128xf32>
      %c0_34 = arith.constant 0 : index
      %c0_35 = arith.constant 0 : index
      %39 = vector.load %arg7[%c0_34, %c0_35] : memref<48x128xf32, #tpu.memory_space<vmem>>, vector<48x128xf32>
      tpu.vector_store %arg7[%c0_34, %c0_35], %38 {strides = array<i32>} : memref<48x128xf32, #tpu.memory_space<vmem>>, vector<48x128xf32>,
    } else {
    }
    return
  }
  func.func @transform_0(%arg0: i32, %arg1: i32) -> (i32, i32) {
    %c0_i32 = arith.constant 0 : i32
    %c0_i32_0 = arith.constant 0 : i32
    %c0_i32_1 = arith.constant 0 : i32
    return %c0_i32, %c0_i32_0 : i32, i32
  }
  func.func @transform_1(%arg0: i32, %arg1: i32) -> (i32, i32) {
    %c1_i32 = arith.constant 1 : i32
    %0 = arith.muli %arg0, %c1_i32 : i32
    %1 = arith.addi %0, %arg1 : i32
    %c0_i32 = arith.constant 0 : i32
    %c0_i32_0 = arith.constant 0 : i32
    return %1, %c0_i32 : i32, i32
  }
  func.func @transform_2(%arg0: i32, %arg1: i32) -> (i32, i32) {
    %c1_i32 = arith.constant 1 : i32
    %0 = arith.muli %arg0, %c1_i32 : i32
    %1 = arith.addi %0, %arg1 : i32
    %c0_i32 = arith.constant 0 : i32
    %c0_i32_0 = arith.constant 0 : i32
    return %1, %c0_i32 : i32, i32
  }
  func.func @transform_3(%arg0: i32, %arg1: i32) -> (i32, i32) {
    %c1_i32 = arith.constant 1 : i32
    %0 = arith.muli %arg0, %c1_i32 : i32
    %1 = arith.addi %0, %arg1 : i32
    %c0_i32 = arith.constant 0 : i32
    %c0_i32_0 = arith.constant 0 : i32
    return %1, %c0_i32 : i32, i32
  }
  func.func @transform_4(%arg0: i32, %arg1: i32) -> (i32, i32) {
    %c1_i32 = arith.constant 1 : i32
    %0 = arith.muli %arg0, %c1_i32 : i32
    %1 = arith.addi %0, %arg1 : i32
    %c0_i32 = arith.constant 0 : i32
    %c0_i32_0 = arith.constant 0 : i32
    return %1, %c0_i32 : i32, i32
  }
  func.func @transform_5(%arg0: i32, %arg1: i32) -> (i32, i32) {
    %c0_i32 = arith.constant 0 : i32
    %c0_i32_0 = arith.constant 0 : i32
    return %arg0, %c0_i32 : i32, i32
  }
}

</mosaic_0001>

<bundles_post_ra>
// kernel: tile.14
= control target key start
LH: loop header
LB: loop body
LE: loop exit
PB: predicated region body
PF: predicated region fallthrough
CT: control target
= control target key end

     0   :  { %s40_s0 = inlined_call_operand.vmem [shape: f32[4], index: 0, kind: input, shape index: {}]   ;;  %s41_s1 = inlined_call_operand.vmem [shape: f32[32,4], index: 1, kind: output, shape index: {}]  }
   0x1   :  { %v4_v0 = vld [vmem:[%s40_s0] ss:$0 sm:$0xff] }
   0x2   :  { %5 = vst [vmem:[%s41_s1] sm:$0xff] %v4_v0 }
   0x3   :  { %12 = vst [vmem:[%s41_s1 + $0x8] sm:$0xff] %v4_v0 }
   0x4   :  { %13 = vst [vmem:[%s41_s1 + $0x10] sm:$0xff] %v4_v0 }
   0x5   :  { %14 = vst [vmem:[%s41_s1 + $0x18] sm:$0xff] %v4_v0 }

// kernel: adaptive_weighted_hybrid_loss.1
= control target key start
LH: loop header
LB: loop body
LE: loop exit
PB: predicated region body
PF: predicated region fallthrough
CT: control target
= control target key end

     0   :  { %v150_v0 = vmov 0.0   ;;  %s217_s0 = inlined_call_operand.vmem [shape: f32[8,128], index: 0, kind: input, shape index: {}]   ;;  %s218_s2 = inlined_call_operand.vmem [shape: f32[1,128], index: 2, kind: input, shape index: {}]   ;;  %s219_s1 = inlined_call_operand.vmem [shape: f32[1,128], index: 1, kind: input, shape index: {}]   ;;  %s220_s4 = inlined_call_operand.vmem [shape: f32[1,128], index: 4, kind: input, shape index: {}]   ;;  %s221_s3 = inlined_call_operand.vmem [shape: f32[1,128], index: 3, kind: input, shape index: {}]   ;;  %s222_s5 = inlined_call_operand.vmem [shape: f32[48,128], index: 5, kind: output, shape index: {}]  }
   0x1   :  { %80 = vst [vmem:[#allocation2 + $0x28] sm:$0xff] %v150_v0  ;;  %v87_v1 = vld [vmem:[%s218_s2] sm:$0x1]  ;;  %v92_v7 = vld [vmem:[%s217_s0 + $0x1] sm:$0x1] }
   0x2   :  { %v90_v2 = vld [vmem:[%s217_s0] sm:$0x1]  ;;  %81 = vst [vmem:[#allocation2 + $0x10] sm:$0xff] %v150_v0 }
   0x3   :  { %v91_v3 = vsub.f32 %v87_v1, %v90_v2  ;;  %v86_v4 = vld [vmem:[%s219_s1] sm:$0x1]  ;;  %82 = vst [vmem:[#allocation2 + $0x8] sm:$0xff] %v150_v0 }
   0x4   :  { %v89_v5 = vld [vmem:[%s220_s4] sm:$0x1]  ;;  %v94_v6 = vsub.f32 %v86_v4, %v87_v1  ;;  %83 = vst [vmem:[#allocation2] sm:$0xff] %v150_v0 }
   0x5   :  { %v88_v8 = vld [vmem:[%s221_s3] sm:$0x1]  ;;  %84 = vst [vmem:[#allocation2 + $0x18] sm:$0xff] %v150_v0  ;;  %v93_v9 = vsub.f32 %v89_v5, %v92_v7  ;;  %v100_v10 = vmul.f32 %v91_v3, %v91_v3 }
   0x6   :  { %85 = vst [vmem:[#allocation2 + $0x20] sm:$0xff] %v150_v0  ;;  %v95_v11 = vsub.f32 %v88_v8, %v89_v5  ;;  %v104_v12 = vmul.f32 %v94_v6, %v94_v6 }
   0x7   :  { %v111_v16 = vmul.f32 %v93_v9, %v93_v9 }
   0x8   :  { %v96_v13 = vld [vmem:[#allocation2 + $0x28] sm:$0x1]  ;;  %v115_v19 = vmul.f32 %v95_v11, %v95_v11 }
   0x9   :  { %v97_v14 = vadd.f32 %v96_v13, %v91_v3  ;;  %v99_v15 = vld [vmem:[#allocation2 + $0x10] sm:$0x1] }
   0xa   :  { %v101_v17 = vadd.f32 %v100_v10, %v99_v15  ;;  %v103_v18 = vld [vmem:[#allocation2 + $0x8] sm:$0x1] }
   0xb   :  { %98 = vst [vmem:[#allocation2 + $0x28] sm:$0x1] %v97_v14  ;;  %v105_v20 = vadd.f32 %v104_v12, %v103_v18  ;;  %v107_v21 = vld [vmem:[#allocation2] sm:$0x1] }
   0xc   :  { %102 = vst [vmem:[#allocation2 + $0x10] sm:$0x1] %v101_v17  ;;  %v108_v22 = vadd.f32 %v107_v21, %v93_v9  ;;  %v110_v23 = vld [vmem:[#allocation2 + $0x18] sm:$0x1] }
   0xd   :  { %106 = vst [vmem:[#allocation2 + $0x8] sm:$0x1] %v105_v20  ;;  %v112_v24 = vadd.f32 %v111_v16, %v110_v23  ;;  %v114_v25 = vld [vmem:[#allocation2 + $0x20] sm:$0x1] }
   0xe   :  { %109 = vst [vmem:[#allocation2] sm:$0x1] %v108_v22  ;;  %v116_v26 = vadd.f32 %v115_v19, %v114_v25 }
   0xf   :  { %113 = vst [vmem:[#allocation2 + $0x18] sm:$0x1] %v112_v24 }
  0x10   :  { %117 = vst [vmem:[#allocation2 + $0x20] sm:$0x1] %v116_v26 }
  0x12   :  { %v121_v27 = vld [vmem:[#allocation2 + $0x28] sm:$0xff] }
  0x13   :  { %127 = vst [vmem:[%s222_s5] sm:$0xff] %v121_v27  ;;  %v122_v28 = vld [vmem:[#allocation2 + $0x10] sm:$0xff] }
  0x14   :  { %128 = vst [vmem:[%s222_s5 + $0x8] sm:$0xff] %v122_v28  ;;  %v123_v29 = vld [vmem:[#allocation2 + $0x8] sm:$0xff] }
  0x15   :  { %129 = vst [vmem:[%s222_s5 + $0x10] sm:$0xff] %v123_v29  ;;  %v124_v30 = vld [vmem:[#allocation2] sm:$0xff] }
  0x16   :  { %130 = vst [vmem:[%s222_s5 + $0x18] sm:$0xff] %v124_v30  ;;  %v125_v31 = vld [vmem:[#allocation2 + $0x18] sm:$0xff] }
  0x17   :  { %131 = vst [vmem:[%s222_s5 + $0x20] sm:$0xff] %v125_v31  ;;  %v126_v32 = vld [vmem:[#allocation2 + $0x20] sm:$0xff] }
  0x18   :  { %132 = vst [vmem:[%s222_s5 + $0x28] sm:$0xff] %v126_v32 }

</bundles_post_ra>
